<compile_context>
chip_gen: v6e
topology: v6e:2x2x1
jax: 0.10.0
libtpu: 0.0.40
codegen_flags: <defaults>
</compile_context>

<pallas_src>
import math
from functools import partial

import jax
import jax.numpy as jnp
from jax.experimental import pallas as pl
from jax.experimental.pallas import tpu as pltpu


LANE = 128
SUBLANE_BF16 = 16


def _round_up(x, m):
    return ((x + m - 1) // m) * m


# ----------------------------- fused Pallas kernel ---------------------------

def sage_fused_kernel(at0_ref, at1_ref, at2_ref, x_ref,
                      wn0_ref, ws0_ref, b0_ref,
                      wn1_ref, ws1_ref, b1_ref,
                      wn2_ref, ws2_ref, b2_ref,
                      out_ref, *, deg_cols):
    """Three fused SAGEConv layers; activations stay in VMEM / vregs."""

    def sage_layer(at_ref, feat, wn_ref, ws_ref, b_ref, deg_col, relu):
        # at:   [n_dst, n_src] bf16 (A transposed host-side; 0/1 values exact)
        # feat: [n_src, p_in]  bf16, with feat[:, deg_col] == 1.0 (ones-lane)
        at = at_ref[...]                      # fed to the MXU with no copy
        n_dst = at.shape[0]

        # Aggregate-then-project:  agg = A^T @ feat  (un-normalized).
        agg = jnp.dot(at, feat, preferred_element_type=jnp.float32)   # [n_dst, p_in]

        # Degree falls out of the same dot via the spare ones-lane of feat.
        deg = agg[:, deg_col:deg_col + 1]                             # [n_dst, 1]
        inv_deg = jnp.where(deg > 0.0, 1.0 / deg, 0.0)                # exact recip
        agg = agg * inv_deg                       # normalize rows: O(n_dst*p_in)

        # fc_neigh(agg) + fc_self(feat_dst) + bias : two accumulating MXU dots,
        # no lane-concat materialization.
        rst = (jnp.dot(agg.astype(jnp.bfloat16), wn_ref[...],
                       preferred_element_type=jnp.float32)
               + jnp.dot(feat[:n_dst, :], ws_ref[...],
                         preferred_element_type=jnp.float32)
               + b_ref[...])
        if relu:
            rst = jnp.maximum(rst, 0.0)                               # F.relu
        # dropout(0.5) in eval mode == identity.
        return rst

    h = x_ref[...]                                                    # bf16
    h = sage_layer(at0_ref, h, wn0_ref, ws0_ref, b0_ref,
                   deg_cols[0], True).astype(jnp.bfloat16)
    h = sage_layer(at1_ref, h, wn1_ref, ws1_ref, b1_ref,
                   deg_cols[1], True).astype(jnp.bfloat16)
    h = sage_layer(at2_ref, h, wn2_ref, ws2_ref, b2_ref,
                   deg_cols[2], False)
    out_ref[...] = h                                                  # f32


# ------------------------------- wrapper --------------------------------------

def sage_forward_pallas(sampled_matrices, x, params):
    """Full 3-layer SAGE forward as a single fused Pallas call.

    sampled_matrices: dense adjacencies A_i [n_src_i, n_dst_i] (float, 0/1)
    x:                [n0, in_size] float32 features (dst nodes are rows :n_dst)
    params:           list of (w_neigh [in,out], w_self [in,out], bias [out])
    """
    assert len(sampled_matrices) == len(params) == 3
    in_size = params[0][0].shape[0]
    hid_size = params[0][0].shape[1]
    out_size = params[2][0].shape[1]

    # per-hop node counts n0..n3, padded to bf16 sublane multiples
    n_nodes = [sampled_matrices[0].shape[0]] + [a.shape[1] for a in sampled_matrices]
    p_nodes = [_round_up(n, SUBLANE_BF16) for n in n_nodes]

    # feature-lane padding to 128; +1 reserves a spare "ones" lane so the
    # degree falls out of the aggregation matmul.
    p_in = _round_up(in_size + 1, LANE)
    p_hid = _round_up(hid_size + 1, LANE)
    p_out = _round_up(out_size, LANE)

    # --- adjacencies: pre-transposed [n_dst, n_src], zero-padded, bf16 ---
    at_list = []
    for i, a in enumerate(sampled_matrices):
        n_src, n_dst = a.shape
        at = jnp.zeros((p_nodes[i + 1], p_nodes[i]), jnp.float32)
        at = at.at[:n_dst, :n_src].set(a.T)
        at_list.append(at.astype(jnp.bfloat16))

    # --- features: pad lanes, set ones-lane at column in_size ---
    n0 = x.shape[0]
    x_pad = jnp.zeros((p_nodes[0], p_in), jnp.float32)
    x_pad = x_pad.at[:n0, :in_size].set(x)
    x_pad = x_pad.at[:, in_size].set(1.0)
    x_pad = x_pad.astype(jnp.bfloat16)

    # --- weights / biases: padded, bf16 weights, f32 bias.  The hidden-layer
    # biases carry a 1.0 in the padded lane `hid_size` so the ones-lane
    # propagates to the next layer's features (relu(1.0) == 1.0). ---
    dims = [(in_size, hid_size, p_in, p_hid, True),
            (hid_size, hid_size, p_hid, p_hid, True),
            (hid_size, out_size, p_hid, p_out, False)]
    packed = []
    for (w_neigh, w_self, bias), (fin, fout, pin, pout, ones_lane) in zip(params, dims):
        wn = jnp.zeros((pin, pout), jnp.float32).at[:fin, :fout].set(w_neigh)
        ws = jnp.zeros((pin, pout), jnp.float32).at[:fin, :fout].set(w_self)
        b = jnp.zeros((1, pout), jnp.float32).at[0, :fout].set(bias)
        if ones_lane:
            b = b.at[0, hid_size].set(1.0)
        packed.append((wn.astype(jnp.bfloat16), ws.astype(jnp.bfloat16), b))

    inputs = (at_list[0], at_list[1], at_list[2], x_pad,
              packed[0][0], packed[0][1], packed[0][2],
              packed[1][0], packed[1][1], packed[1][2],
              packed[2][0], packed[2][1], packed[2][2])

    kernel = partial(sage_fused_kernel,
                     deg_cols=(in_size, hid_size, hid_size))

    out_pad = pl.pallas_call(
        kernel,
        out_shape=jax.ShapeDtypeStruct((p_nodes[3], p_out), jnp.float32),
        grid=(1,),
        in_specs=[pl.BlockSpec(t.shape, lambda i: (0, 0)) for t in inputs],
        out_specs=pl.BlockSpec((p_nodes[3], p_out), lambda i: (0, 0)),
        compiler_params=pltpu.CompilerParams(
            dimension_semantics=("arbitrary",),
            vmem_limit_bytes=32 * 1024 * 1024),
    )(*inputs)

    return out_pad[:n_nodes[3], :out_size]


# --------------------------- parameter init -----------------------------------

def xavier_uniform(key, in_feats, out_feats, gain):
    # torch xavier_uniform_ on weight [out, in]; stored transposed [in, out]
    bound = gain * math.sqrt(6.0 / (in_feats + out_feats))
    return jax.random.uniform(key, (in_feats, out_feats),
                              dtype=jnp.float32, minval=-bound, maxval=bound)


def init_sage_params(key, in_size, hid_size, out_size):
    gain = math.sqrt(2.0)  # nn.init.calculate_gain('relu')
    dims = [(in_size, hid_size), (hid_size, hid_size), (hid_size, out_size)]
    params = []
    for (fin, fout) in dims:
        key, k1, k2, k3 = jax.random.split(key, 4)
        w_neigh = xavier_uniform(k1, fin, fout, gain)
        w_self = xavier_uniform(k2, fin, fout, gain)
        # nn.Linear default bias init: U(-1/sqrt(fan_in), 1/sqrt(fan_in))
        bb = 1.0 / math.sqrt(fin)
        bias = jax.random.uniform(k3, (fout,), dtype=jnp.float32,
                                  minval=-bb, maxval=bb)
        params.append((w_neigh, w_self, bias))
    return params


# --------------------------- pure-JAX reference --------------------------------

def sage_forward_ref(sampled_matrices, x, params):
    hidden_x = x
    n_layers = len(params)
    for layer_idx, (A, (w_neigh, w_self, bias)) in enumerate(
            zip(sampled_matrices, params)):
        n_dst = A.shape[1]
        srcdata = hidden_x @ w_neigh
        inv_deg = 1.0 / A.sum(axis=0)
        dstdata = (A * inv_deg[None, :]).T @ srcdata
        rst = hidden_x[:n_dst] @ w_self + bias[None, :] + dstdata
        if layer_idx != n_layers - 1:
            rst = jnp.maximum(rst, 0.0)
        hidden_x = rst
    return hidden_x


# --------------------------------- main -----------------------------------------

if __name__ == "__main__":
    key = jax.random.PRNGKey(0)

    in_size, hid_size, out_size = 16, 32, 8
    # sampled-subgraph node counts per hop (src -> dst shrinks each layer)
    n0, n1, n2, n3 = 64, 32, 16, 8

    key, kx, ka0, ka1, ka2, kp = jax.random.split(key, 6)
    x = jax.random.normal(kx, (n0, in_size), dtype=jnp.float32)

    def make_adj(k, n_src, n_dst):
        # dense 0/1 adjacency with every dst column having >=1 neighbor
        a = (jax.random.uniform(k, (n_src, n_dst)) < 0.3).astype(jnp.float32)
        diag = jnp.zeros((n_src, n_dst)).at[jnp.arange(n_dst),
                                            jnp.arange(n_dst)].set(1.0)
        return jnp.maximum(a, diag)

    sampled_matrices = [
        make_adj(ka0, n0, n1),
        make_adj(ka1, n1, n2),
        make_adj(ka2, n2, n3),
    ]

    params = init_sage_params(kp, in_size, hid_size, out_size)

    out = sage_forward_pallas(sampled_matrices, x, params)
    out = jax.block_until_ready(out)

    ref = sage_forward_ref(sampled_matrices, x, params)
    assert out.shape == (n3, out_size)
    # reciprocal is now exact; remaining error is bf16 matmul rounding over 3 layers
    assert jnp.allclose(out, ref, atol=1e-1, rtol=5e-2), (
        float(jnp.max(jnp.abs(out - ref))))

    print("KERNEL_OK")
</pallas_src>

<mosaic_0001>
module attributes {stable_mosaic.version = 11 : i64} {
  func.func @sage_fused_kernel(%arg0: i32, %arg1: memref<32x64xbf16, #tpu.memory_space<vmem>>, %arg2: memref<16x32xbf16, #tpu.memory_space<vmem>>, %arg3: memref<16x16xbf16, #tpu.memory_space<vmem>>, %arg4: memref<64x128xbf16, #tpu.memory_space<vmem>>, %arg5: memref<128x128xbf16, #tpu.memory_space<vmem>>, %arg6: memref<128x128xbf16, #tpu.memory_space<vmem>>, %arg7: memref<1x128xf32, #tpu.memory_space<vmem>>, %arg8: memref<128x128xbf16, #tpu.memory_space<vmem>>, %arg9: memref<128x128xbf16, #tpu.memory_space<vmem>>, %arg10: memref<1x128xf32, #tpu.memory_space<vmem>>, %arg11: memref<128x128xbf16, #tpu.memory_space<vmem>>, %arg12: memref<128x128xbf16, #tpu.memory_space<vmem>>, %arg13: memref<1x128xf32, #tpu.memory_space<vmem>>, %arg14: memref<16x128xf32, #tpu.memory_space<vmem>>) attributes {dimension_semantics = [#tpu.dimension_semantics<arbitrary>], iteration_bounds = array<i64: 1>, scalar_prefetch = 0 : i64, scratch_operands = 0 : i64, tpu.core_type = #tpu.core_type<tc>, window_params = [{pipeline_mode = #tpu.pipeline_mode<synchronous>, transform_indices = @transform_0, window_bounds = array<i64: 32, 64>}, {pipeline_mode = #tpu.pipeline_mode<synchronous>, transform_indices = @transform_1, window_bounds = array<i64: 16, 32>}, {pipeline_mode = #tpu.pipeline_mode<synchronous>, transform_indices = @transform_2, window_bounds = array<i64: 16, 16>}, {pipeline_mode = #tpu.pipeline_mode<synchronous>, transform_indices = @transform_3, window_bounds = array<i64: 64, 128>}, {pipeline_mode = #tpu.pipeline_mode<synchronous>, transform_indices = @transform_4, window_bounds = array<i64: 128, 128>}, {pipeline_mode = #tpu.pipeline_mode<synchronous>, transform_indices = @transform_5, window_bounds = array<i64: 128, 128>}, {pipeline_mode = #tpu.pipeline_mode<synchronous>, transform_indices = @transform_6, window_bounds = array<i64: 1, 128>}, {pipeline_mode = #tpu.pipeline_mode<synchronous>, transform_indices = @transform_7, window_bounds = array<i64: 128, 128>}, {pipeline_mode = #tpu.pipeline_mode<synchronous>, transform_indices = @transform_8, window_bounds = array<i64: 128, 128>}, {pipeline_mode = #tpu.pipeline_mode<synchronous>, transform_indices = @transform_9, window_bounds = array<i64: 1, 128>}, {pipeline_mode = #tpu.pipeline_mode<synchronous>, transform_indices = @transform_10, window_bounds = array<i64: 128, 128>}, {pipeline_mode = #tpu.pipeline_mode<synchronous>, transform_indices = @transform_11, window_bounds = array<i64: 128, 128>}, {pipeline_mode = #tpu.pipeline_mode<synchronous>, transform_indices = @transform_12, window_bounds = array<i64: 1, 128>}, {pipeline_mode = #tpu.pipeline_mode<synchronous>, transform_indices = @transform_13, window_bounds = array<i64: 16, 128>}]} {
    %c0 = arith.constant 0 : index
    %c0_0 = arith.constant 0 : index
    %0 = vector.load %arg4[%c0, %c0_0] : memref<64x128xbf16, #tpu.memory_space<vmem>>, vector<64x128xbf16>
    %c0_1 = arith.constant 0 : index
    %c0_2 = arith.constant 0 : index
    %1 = vector.load %arg1[%c0_1, %c0_2] : memref<32x64xbf16, #tpu.memory_space<vmem>>, vector<32x64xbf16>
    %cst = arith.constant dense<0.000000e+00> : vector<32x128xf32>
    %2 = tpu.matmul %1, %0, %cst {dimension_numbers = #tpu.dot_dimension_numbers<[1], [0], [0], [1], [0, 0, 1, 1], [], []>} : vector<32x64xbf16>, vector<64x128xbf16>, vector<32x128xf32> -> vector<32x128xf32>
    %3 = vector.extract_strided_slice %2 {offsets = [0, 16], sizes = [32, 1], strides = [1, 1]} : vector<32x128xf32> to vector<32x1xf32>
    %cst_3 = arith.constant 0.000000e+00 : f32
    %4 = vector.broadcast %cst_3 : f32 to vector<32x1xf32>
    %5 = arith.cmpf ogt, %3, %4 : vector<32x1xf32>
    %cst_4 = arith.constant 1.000000e+00 : f32
    %6 = vector.broadcast %cst_4 : f32 to vector<32x1xf32>
    %7 = arith.divf %6, %3 : vector<32x1xf32>
    %cst_5 = arith.constant 0.000000e+00 : f32
    %8 = vector.broadcast %cst_5 : f32 to vector<32x1xf32>
    %9 = arith.select %5, %7, %8 : vector<32x1xi1>, vector<32x1xf32>
    %10 = vector.broadcast %9 : vector<32x1xf32> to vector<32x128xf32>
    %11 = arith.mulf %2, %10 : vector<32x128xf32>
    %12 = arith.truncf %11 : vector<32x128xf32> to vector<32x128xbf16>
    %c0_6 = arith.constant 0 : index
    %c0_7 = arith.constant 0 : index
    %13 = vector.load %arg5[%c0_6, %c0_7] : memref<128x128xbf16, #tpu.memory_space<vmem>>, vector<128x128xbf16>
    %cst_8 = arith.constant dense<0.000000e+00> : vector<32x128xf32>
    %14 = tpu.matmul %12, %13, %cst_8 {dimension_numbers = #tpu.dot_dimension_numbers<[1], [0], [0], [1], [0, 0, 1, 1], [], []>} : vector<32x128xbf16>, vector<128x128xbf16>, vector<32x128xf32> -> vector<32x128xf32>
    %15 = vector.extract_strided_slice %0 {offsets = [0, 0], sizes = [32, 128], strides = [1, 1]} : vector<64x128xbf16> to vector<32x128xbf16>
    %c0_9 = arith.constant 0 : index
    %c0_10 = arith.constant 0 : index
    %16 = vector.load %arg6[%c0_9, %c0_10] : memref<128x128xbf16, #tpu.memory_space<vmem>>, vector<128x128xbf16>
    %cst_11 = arith.constant dense<0.000000e+00> : vector<32x128xf32>
    %17 = tpu.matmul %15, %16, %cst_11 {dimension_numbers = #tpu.dot_dimension_numbers<[1], [0], [0], [1], [0, 0, 1, 1], [], []>} : vector<32x128xbf16>, vector<128x128xbf16>, vector<32x128xf32> -> vector<32x128xf32>
    %18 = arith.addf %14, %17 : vector<32x128xf32>
    %c0_12 = arith.constant 0 : index
    %c0_13 = arith.constant 0 : index
    %19 = vector.load %arg7[%c0_12, %c0_13] : memref<1x128xf32, #tpu.memory_space<vmem>>, vector<1x128xf32>
    %20 = vector.broadcast %19 : vector<1x128xf32> to vector<32x128xf32>
    %21 = arith.addf %18, %20 : vector<32x128xf32>
    %cst_14 = arith.constant 0.000000e+00 : f32
    %22 = vector.broadcast %cst_14 : f32 to vector<32x128xf32>
    %23 = arith.maximumf %21, %22 : vector<32x128xf32>
    %24 = arith.truncf %23 : vector<32x128xf32> to vector<32x128xbf16>
    %c0_15 = arith.constant 0 : index
    %c0_16 = arith.constant 0 : index
    %25 = vector.load %arg2[%c0_15, %c0_16] : memref<16x32xbf16, #tpu.memory_space<vmem>>, vector<16x32xbf16>
    %cst_17 = arith.constant dense<0.000000e+00> : vector<16x128xf32>
    %26 = tpu.matmul %25, %24, %cst_17 {dimension_numbers = #tpu.dot_dimension_numbers<[1], [0], [0], [1], [0, 0, 1, 1], [], []>} : vector<16x32xbf16>, vector<32x128xbf16>, vector<16x128xf32> -> vector<16x128xf32>
    %27 = vector.extract_strided_slice %26 {offsets = [0, 32], sizes = [16, 1], strides = [1, 1]} : vector<16x128xf32> to vector<16x1xf32>
    %cst_18 = arith.constant 0.000000e+00 : f32
    %28 = vector.broadcast %cst_18 : f32 to vector<16x1xf32>
    %29 = arith.cmpf ogt, %27, %28 : vector<16x1xf32>
    %cst_19 = arith.constant 1.000000e+00 : f32
    %30 = vector.broadcast %cst_19 : f32 to vector<16x1xf32>
    %31 = arith.divf %30, %27 : vector<16x1xf32>
    %cst_20 = arith.constant 0.000000e+00 : f32
    %32 = vector.broadcast %cst_20 : f32 to vector<16x1xf32>
    %33 = arith.select %29, %31, %32 : vector<16x1xi1>, vector<16x1xf32>
    %34 = vector.broadcast %33 : vector<16x1xf32> to vector<16x128xf32>
    %35 = arith.mulf %26, %34 : vector<16x128xf32>
    %36 = arith.truncf %35 : vector<16x128xf32> to vector<16x128xbf16>
    %c0_21 = arith.constant 0 : index
    %c0_22 = arith.constant 0 : index
    %37 = vector.load %arg8[%c0_21, %c0_22] : memref<128x128xbf16, #tpu.memory_space<vmem>>, vector<128x128xbf16>
    %cst_23 = arith.constant dense<0.000000e+00> : vector<16x128xf32>
    %38 = tpu.matmul %36, %37, %cst_23 {dimension_numbers = #tpu.dot_dimension_numbers<[1], [0], [0], [1], [0, 0, 1, 1], [], []>} : vector<16x128xbf16>, vector<128x128xbf16>, vector<16x128xf32> -> vector<16x128xf32>
    %39 = vector.extract_strided_slice %24 {offsets = [0, 0], sizes = [16, 128], strides = [1, 1]} : vector<32x128xbf16> to vector<16x128xbf16>
    %c0_24 = arith.constant 0 : index
    %c0_25 = arith.constant 0 : index
    %40 = vector.load %arg9[%c0_24, %c0_25] : memref<128x128xbf16, #tpu.memory_space<vmem>>, vector<128x128xbf16>
    %cst_26 = arith.constant dense<0.000000e+00> : vector<16x128xf32>
    %41 = tpu.matmul %39, %40, %cst_26 {dimension_numbers = #tpu.dot_dimension_numbers<[1], [0], [0], [1], [0, 0, 1, 1], [], []>} : vector<16x128xbf16>, vector<128x128xbf16>, vector<16x128xf32> -> vector<16x128xf32>
    %42 = arith.addf %38, %41 : vector<16x128xf32>
    %c0_27 = arith.constant 0 : index
    %c0_28 = arith.constant 0 : index
    %43 = vector.load %arg10[%c0_27, %c0_28] : memref<1x128xf32, #tpu.memory_space<vmem>>, vector<1x128xf32>
    %44 = vector.broadcast %43 : vector<1x128xf32> to vector<16x128xf32>
    %45 = arith.addf %42, %44 : vector<16x128xf32>
    %cst_29 = arith.constant 0.000000e+00 : f32
    %46 = vector.broadcast %cst_29 : f32 to vector<16x128xf32>
    %47 = arith.maximumf %45, %46 : vector<16x128xf32>
    %48 = arith.truncf %47 : vector<16x128xf32> to vector<16x128xbf16>
    %c0_30 = arith.constant 0 : index
    %c0_31 = arith.constant 0 : index
    %49 = vector.load %arg3[%c0_30, %c0_31] : memref<16x16xbf16, #tpu.memory_space<vmem>>, vector<16x16xbf16>
    %cst_32 = arith.constant dense<0.000000e+00> : vector<16x128xf32>
    %50 = tpu.matmul %49, %48, %cst_32 {dimension_numbers = #tpu.dot_dimension_numbers<[1], [0], [0], [1], [0, 0, 1, 1], [], []>} : vector<16x16xbf16>, vector<16x128xbf16>, vector<16x128xf32> -> vector<16x128xf32>
    %51 = vector.extract_strided_slice %50 {offsets = [0, 32], sizes = [16, 1], strides = [1, 1]} : vector<16x128xf32> to vector<16x1xf32>
    %cst_33 = arith.constant 0.000000e+00 : f32
    %52 = vector.broadcast %cst_33 : f32 to vector<16x1xf32>
    %53 = arith.cmpf ogt, %51, %52 : vector<16x1xf32>
    %cst_34 = arith.constant 1.000000e+00 : f32
    %54 = vector.broadcast %cst_34 : f32 to vector<16x1xf32>
    %55 = arith.divf %54, %51 : vector<16x1xf32>
    %cst_35 = arith.constant 0.000000e+00 : f32
    %56 = vector.broadcast %cst_35 : f32 to vector<16x1xf32>
    %57 = arith.select %53, %55, %56 : vector<16x1xi1>, vector<16x1xf32>
    %58 = vector.broadcast %57 : vector<16x1xf32> to vector<16x128xf32>
    %59 = arith.mulf %50, %58 : vector<16x128xf32>
    %60 = arith.truncf %59 : vector<16x128xf32> to vector<16x128xbf16>
    %c0_36 = arith.constant 0 : index
    %c0_37 = arith.constant 0 : index
    %61 = vector.load %arg11[%c0_36, %c0_37] : memref<128x128xbf16, #tpu.memory_space<vmem>>, vector<128x128xbf16>
    %cst_38 = arith.constant dense<0.000000e+00> : vector<16x128xf32>
    %62 = tpu.matmul %60, %61, %cst_38 {dimension_numbers = #tpu.dot_dimension_numbers<[1], [0], [0], [1], [0, 0, 1, 1], [], []>} : vector<16x128xbf16>, vector<128x128xbf16>, vector<16x128xf32> -> vector<16x128xf32>
    %c0_39 = arith.constant 0 : index
    %c0_40 = arith.constant 0 : index
    %63 = vector.load %arg12[%c0_39, %c0_40] : memref<128x128xbf16, #tpu.memory_space<vmem>>, vector<128x128xbf16>
    %cst_41 = arith.constant dense<0.000000e+00> : vector<16x128xf32>
    %64 = tpu.matmul %48, %63, %cst_41 {dimension_numbers = #tpu.dot_dimension_numbers<[1], [0], [0], [1], [0, 0, 1, 1], [], []>} : vector<16x128xbf16>, vector<128x128xbf16>, vector<16x128xf32> -> vector<16x128xf32>
    %65 = arith.addf %62, %64 : vector<16x128xf32>
    %c0_42 = arith.constant 0 : index
    %c0_43 = arith.constant 0 : index
    %66 = vector.load %arg13[%c0_42, %c0_43] : memref<1x128xf32, #tpu.memory_space<vmem>>, vector<1x128xf32>
    %67 = vector.broadcast %66 : vector<1x128xf32> to vector<16x128xf32>
    %68 = arith.addf %65, %67 : vector<16x128xf32>
    %c0_44 = arith.constant 0 : index
    %c0_45 = arith.constant 0 : index
    %69 = vector.load %arg14[%c0_44, %c0_45] : memref<16x128xf32, #tpu.memory_space<vmem>>, vector<16x128xf32>
    tpu.vector_store %arg14[%c0_44, %c0_45], %68 {strides = array<i32>} : memref<16x128xf32, #tpu.memory_space<vmem>>, vector<16x128xf32>,
    return
  }
  func.func @transform_0(%arg0: i32) -> (i32, i32) {
    %c0_i32 = arith.constant 0 : i32
    %c0_i32_0 = arith.constant 0 : i32
    %c0_i32_1 = arith.constant 0 : i32
    return %c0_i32, %c0_i32_0 : i32, i32
  }
  func.func @transform_1(%arg0: i32) -> (i32, i32) {
    %c0_i32 = arith.constant 0 : i32
    %c0_i32_0 = arith.constant 0 : i32
    %c0_i32_1 = arith.constant 0 : i32
    return %c0_i32, %c0_i32_0 : i32, i32
  }
  func.func @transform_2(%arg0: i32) -> (i32, i32) {
    %c0_i32 = arith.constant 0 : i32
    %c0_i32_0 = arith.constant 0 : i32
    %c0_i32_1 = arith.constant 0 : i32
    return %c0_i32, %c0_i32_0 : i32, i32
  }
  func.func @transform_3(%arg0: i32) -> (i32, i32) {
    %c0_i32 = arith.constant 0 : i32
    %c0_i32_0 = arith.constant 0 : i32
    %c0_i32_1 = arith.constant 0 : i32
    return %c0_i32, %c0_i32_0 : i32, i32
  }
  func.func @transform_4(%arg0: i32) -> (i32, i32) {
    %c0_i32 = arith.constant 0 : i32
    %c0_i32_0 = arith.constant 0 : i32
    %c0_i32_1 = arith.constant 0 : i32
    return %c0_i32, %c0_i32_0 : i32, i32
  }
  func.func @transform_5(%arg0: i32) -> (i32, i32) {
    %c0_i32 = arith.constant 0 : i32
    %c0_i32_0 = arith.constant 0 : i32
    %c0_i32_1 = arith.constant 0 : i32
    return %c0_i32, %c0_i32_0 : i32, i32
  }
  func.func @transform_6(%arg0: i32) -> (i32, i32) {
    %c0_i32 = arith.constant 0 : i32
    %c0_i32_0 = arith.constant 0 : i32
    %c0_i32_1 = arith.constant 0 : i32
    return %c0_i32, %c0_i32_0 : i32, i32
  }
  func.func @transform_7(%arg0: i32) -> (i32, i32) {
    %c0_i32 = arith.constant 0 : i32
    %c0_i32_0 = arith.constant 0 : i32
    %c0_i32_1 = arith.constant 0 : i32
    return %c0_i32, %c0_i32_0 : i32, i32
  }
  func.func @transform_8(%arg0: i32) -> (i32, i32) {
    %c0_i32 = arith.constant 0 : i32
    %c0_i32_0 = arith.constant 0 : i32
    %c0_i32_1 = arith.constant 0 : i32
    return %c0_i32, %c0_i32_0 : i32, i32
  }
  func.func @transform_9(%arg0: i32) -> (i32, i32) {
    %c0_i32 = arith.constant 0 : i32
    %c0_i32_0 = arith.constant 0 : i32
    %c0_i32_1 = arith.constant 0 : i32
    return %c0_i32, %c0_i32_0 : i32, i32
  }
  func.func @transform_10(%arg0: i32) -> (i32, i32) {
    %c0_i32 = arith.constant 0 : i32
    %c0_i32_0 = arith.constant 0 : i32
    %c0_i32_1 = arith.constant 0 : i32
    return %c0_i32, %c0_i32_0 : i32, i32
  }
  func.func @transform_11(%arg0: i32) -> (i32, i32) {
    %c0_i32 = arith.constant 0 : i32
    %c0_i32_0 = arith.constant 0 : i32
    %c0_i32_1 = arith.constant 0 : i32
    return %c0_i32, %c0_i32_0 : i32, i32
  }
  func.func @transform_12(%arg0: i32) -> (i32, i32) {
    %c0_i32 = arith.constant 0 : i32
    %c0_i32_0 = arith.constant 0 : i32
    %c0_i32_1 = arith.constant 0 : i32
    return %c0_i32, %c0_i32_0 : i32, i32
  }
  func.func @transform_13(%arg0: i32) -> (i32, i32) {
    %c0_i32 = arith.constant 0 : i32
    %c0_i32_0 = arith.constant 0 : i32
    %c0_i32_1 = arith.constant 0 : i32
    return %c0_i32, %c0_i32_0 : i32, i32
  }
}

</mosaic_0001>

<bundles_post_ra>
// kernel: tpu_custom_call.1
= control target key start
LH: loop header
LB: loop body
LE: loop exit
PB: predicated region body
PF: predicated region fallthrough
CT: control target
= control target key end

     0   :  { %18 = vsyncpa [#allocation3], 0  ;;  %s1998_s0 = inlined_call_operand.hbm [shape: bf16[32,64], index: 0, kind: input, shape index: {}]   ;;  %s1999_s1 = inlined_call_operand.hbm [shape: bf16[16,32], index: 1, kind: input, shape index: {}]   ;;  %s2000_s2 = inlined_call_operand.hbm [shape: bf16[16,16], index: 2, kind: input, shape index: {}]   ;;  %s2001_s3 = inlined_call_operand.hbm [shape: bf16[64,128], index: 3, kind: input, shape index: {}]   ;;  %s2002_s4 = inlined_call_operand.hbm [shape: bf16[128,128], index: 4, kind: input, shape index: {}]   ;;  %s2003_s5 = inlined_call_operand.hbm [shape: bf16[128,128], index: 5, kind: input, shape index: {}]   ;;  %s2004_s6 = inlined_call_operand.vmem [shape: f32[1,128], index: 6, kind: input, shape index: {}]   ;;  %s2005_s7 = inlined_call_operand.hbm [shape: bf16[128,128], index: 7, kind: input, shape index: {}]   ;;  %s2006_s8 = inlined_call_operand.hbm [shape: bf16[128,128], index: 8, kind: input, shape index: {}]   ;;  %s2007_s9 = inlined_call_operand.vmem [shape: f32[1,128], index: 9, kind: input, shape index: {}]   ;;  %s2008_s10 = inlined_call_operand.hbm [shape: bf16[128,128], index: 10, kind: input, shape index: {}]   ;;  %s2009_s11 = inlined_call_operand.hbm [shape: bf16[128,128], index: 11, kind: input, shape index: {}]   ;;  %s2010_s12 = inlined_call_operand.vmem [shape: f32[1,128], index: 12, kind: input, shape index: {}]   ;;  %s2011_s13 = inlined_call_operand.hbm [shape: f32[16,128], index: 13, kind: output, shape index: {}]  }
   0x1   :  { %19 = vsyncpa [#allocation6], 0 }
   0x2   :  { %20 = vsyncpa [#allocation9], 0 }
   0x3   :  { %21 = vsyncpa [#allocation12], 0 }
   0x4   :  { %22 = vsyncpa [#allocation15], 0 }
   0x5   :  { %23 = vsyncpa [#allocation18], 0 }
   0x6   :  { %24 = vsyncpa [#allocation4], 0  ;;  %s1785_s25 = smov [#allocation5]   ;;  %s1786_s27 = smov [#allocation8]  }
   0x7   :  { %s42_s26 = sshll.u32 %s1785_s25, 4  ;;  %s66_s28 = sshll.u32 %s1786_s27, 4  ;;  %s43_s26 = int_to_ptr.vmem [resolvable:$true] %s42_s26  ;;  %s67_s28 = int_to_ptr.vmem [resolvable:$true] %s66_s28 }
   0x8   :  { %s1559_s29 = scalar_lea.vmem %s43_s26, 128  ;;  %p1564_p1 = scmp.lt.s32.totalorder %s43_s26, %s43_s26 }
   0x9   :  { %p1560_p0 = scmp.ne.s32.totalorder %s43_s26, %s1559_s29  ;;  %p1565_p2 = scmp.lt.s32.totalorder %s1559_s29, %s1559_s29 }
   0xb   :  { %p1566_p3 = por %p1565_p2, %p1564_p1 }
   0xd   :  { %p1567_p4 = pnand %p1566_p3, %p1560_p0 }
   0xf   :  { %1570 = shalt.err (!%p1567_p4)
}
  0x10   :  { %s1787_s30 = smov 64   ;;  %s1788_s14 = smov 4  }
  0x11   :  { %48 = dma.hbm_to_vmem [thread:$0]  %s1999_s1, 128, %s43_s26, [#allocation6], %s1787_s30, %s1787_s30, %s1788_s14  }
  0x12   :  { %s1579_s17 = scalar_lea.vmem %s67_s28, 512  ;;  %p1584_p6 = scmp.lt.s32.totalorder %s67_s28, %s67_s28 }
  0x13   :  { %p1580_p5 = scmp.ne.s32.totalorder %s67_s28, %s1579_s17  ;;  %p1585_p7 = scmp.lt.s32.totalorder %s1579_s17, %s1579_s17 }
  0x15   :  { %p1586_p8 = por %p1585_p7, %p1584_p6 }
  0x17   :  { %p1587_p9 = pnand %p1586_p8, %p1580_p5 }
  0x19   :  { %1590 = shalt.err (!%p1587_p9)
}
  0x1a   :  { %72 = dma.hbm_to_vmem [thread:$0]  %s2001_s3, 512, %s67_s28, [#allocation9], %s1787_s30, %s1787_s30, %s1788_s14  }
  0x1b   :  { %s1789_s20 = smov [#allocation11]   ;;  %s1790_s22 = smov [#allocation14]  }
  0x1c   :  { %s90_s21 = sshll.u32 %s1789_s20, 4  ;;  %s116_s23 = sshll.u32 %s1790_s22, 4  ;;  %s91_s21 = int_to_ptr.vmem [resolvable:$true] %s90_s21  ;;  %s117_s23 = int_to_ptr.vmem [resolvable:$true] %s116_s23 }
  0x1d   :  { %s1599_s1 = scalar_lea.vmem %s91_s21, 1024  ;;  %p1604_p11 = scmp.lt.s32.totalorder %s91_s21, %s91_s21 }
  0x1e   :  { %p1600_p10 = scmp.ne.s32.totalorder %s91_s21, %s1599_s1  ;;  %p1605_p12 = scmp.lt.s32.totalorder %s1599_s1, %s1599_s1 }
  0x20   :  { %p1606_p13 = por %p1605_p12, %p1604_p11 }
  0x22   :  { %p1607_p0 = pnand %p1606_p13, %p1600_p10 }
  0x24   :  { %1610 = shalt.err (!%p1607_p0)
}
  0x25   :  { %96 = dma.hbm_to_vmem [thread:$0]  %s2003_s5, 1024, %s91_s21, [#allocation12], %s1787_s30, %s1787_s30, %s1788_s14  }
  0x26   :  { %s1619_s3 = scalar_lea.vmem %s117_s23, 1024  ;;  %p1624_p2 = scmp.lt.s32.totalorder %s117_s23, %s117_s23 }
  0x27   :  { %p1620_p1 = scmp.ne.s32.totalorder %s117_s23, %s1619_s3  ;;  %p1625_p3 = scmp.lt.s32.totalorder %s1619_s3, %s1619_s3 }
  0x29   :  { %p1626_p4 = por %p1625_p3, %p1624_p2 }
  0x2b   :  { %p1627_p5 = pnand %p1626_p4, %p1620_p1 }
  0x2d   :  { %1630 = shalt.err (!%p1627_p5)
}
  0x2e   :  { %122 = dma.hbm_to_vmem [thread:$0]  %s2006_s8, 1024, %s117_s23, [#allocation15], %s1787_s30, %s1787_s30, %s1788_s14  }
  0x2f   :  { %s1791_s28 = smov [#allocation2]   ;;  %s1792_s15 = smov [#allocation7]  }
  0x30   :  { %s30_s29 = sshll.u32 %s1791_s28, 4  ;;  %s54_s16 = sshll.u32 %s1792_s15, 4  ;;  %s31_s29 = int_to_ptr.vmem [resolvable:$true] %s30_s29  ;;  %s55_s16 = int_to_ptr.vmem [resolvable:$true] %s54_s16 }
  0x31   :  { %s1639_s5 = scalar_lea.vmem %s31_s29, 256  ;;  %p1644_p7 = scmp.lt.s32.totalorder %s31_s29, %s31_s29 }
  0x32   :  { %p1640_p6 = scmp.ne.s32.totalorder %s31_s29, %s1639_s5  ;;  %p1645_p8 = scmp.lt.s32.totalorder %s1639_s5, %s1639_s5 }
  0x34   :  { %p1646_p9 = por %p1645_p8, %p1644_p7 }
  0x36   :  { %p1647_p10 = pnand %p1646_p9, %p1640_p6 }
  0x38   :  { %1650 = shalt.err (!%p1647_p10)
}
  0x39   :  { %36 = dma.hbm_to_vmem [thread:$0]  %s1998_s0, 256, %s31_s29, [#allocation3], %s1787_s30, %s1787_s30, %s1788_s14  }
  0x3a   :  { %s1659_s8 = scalar_lea.vmem %s55_s16, 128  ;;  %p1664_p12 = scmp.lt.s32.totalorder %s55_s16, %s55_s16 }
  0x3b   :  { %p1660_p11 = scmp.ne.s32.totalorder %s55_s16, %s1659_s8  ;;  %p1665_p13 = scmp.lt.s32.totalorder %s1659_s8, %s1659_s8 }
  0x3d   :  { %p1666_p0 = por %p1665_p13, %p1664_p12 }
  0x3f   :  { %p1667_p1 = pnand %p1666_p0, %p1660_p11 }
  0x41   :  { %1670 = shalt.err (!%p1667_p1)
}
  0x42   :  { %60 = dma.hbm_to_vmem [thread:$0]  %s2000_s2, 128, %s55_s16, [#allocation6], %s1787_s30, %s1787_s30, %s1788_s14  }
  0x43   :  { %s1793_s21 = smov [#allocation10]   ;;  %s1794_s23 = smov [#allocation13]  }
  0x44   :  { %s78_s22 = sshll.u32 %s1793_s21, 4  ;;  %s104_s1 = sshll.u32 %s1794_s23, 4  ;;  %s79_s22 = int_to_ptr.vmem [resolvable:$true] %s78_s22  ;;  %s105_s1 = int_to_ptr.vmem [resolvable:$true] %s104_s1 }
  0x45   :  { %s1679_s0 = scalar_lea.vmem %s79_s22, 1024  ;;  %p1684_p3 = scmp.lt.s32.totalorder %s79_s22, %s79_s22 }
  0x46   :  { %p1680_p2 = scmp.ne.s32.totalorder %s79_s22, %s1679_s0  ;;  %p1685_p4 = scmp.lt.s32.totalorder %s1679_s0, %s1679_s0 }
  0x48   :  { %p1686_p5 = por %p1685_p4, %p1684_p3 }
  0x4a   :  { %p1687_p6 = pnand %p1686_p5, %p1680_p2 }
  0x4c   :  { %1690 = shalt.err (!%p1687_p6)
}
  0x4d   :  { %84 = dma.hbm_to_vmem [thread:$0]  %s2002_s4, 1024, %s79_s22, [#allocation9], %s1787_s30, %s1787_s30, %s1788_s14  }
  0x4e   :  { %s1699_s2 = scalar_lea.vmem %s105_s1, 1024  ;;  %p1704_p8 = scmp.lt.s32.totalorder %s105_s1, %s105_s1 }
  0x4f   :  { %p1700_p7 = scmp.ne.s32.totalorder %s105_s1, %s1699_s2  ;;  %p1705_p9 = scmp.lt.s32.totalorder %s1699_s2, %s1699_s2 }
  0x51   :  { %p1706_p10 = por %p1705_p9, %p1704_p8 }
  0x53   :  { %p1707_p11 = pnand %p1706_p10, %p1700_p7 }
  0x55   :  { %1710 = shalt.err (!%p1707_p11)
}
  0x56   :  { %110 = dma.hbm_to_vmem [thread:$0]  %s2005_s7, 1024, %s105_s1, [#allocation12], %s1787_s30, %s1787_s30, %s1788_s14  }
  0x57   :  { %s1795_s27 = smov [#allocation16]   ;;  %s1796_s29 = smov [#allocation17]  }
  0x58   :  { %s130_s28 = sshll.u32 %s1795_s27, 4  ;;  %s142_s15 = sshll.u32 %s1796_s29, 4  ;;  %s131_s28 = int_to_ptr.vmem [resolvable:$true] %s130_s28  ;;  %s143_s15 = int_to_ptr.vmem [resolvable:$true] %s142_s15 }
  0x59   :  { %s1719_s4 = scalar_lea.vmem %s131_s28, 1024  ;;  %p1724_p13 = scmp.lt.s32.totalorder %s131_s28, %s131_s28 }
  0x5a   :  { %p1720_p12 = scmp.ne.s32.totalorder %s131_s28, %s1719_s4  ;;  %p1725_p0 = scmp.lt.s32.totalorder %s1719_s4, %s1719_s4 }
  0x5c   :  { %p1726_p1 = por %p1725_p0, %p1724_p13 }
  0x5e   :  { %p1727_p2 = pnand %p1726_p1, %p1720_p12 }
  0x60   :  { %1730 = shalt.err (!%p1727_p2)
}
  0x61   :  { %136 = dma.hbm_to_vmem [thread:$0]  %s2008_s10, 1024, %s131_s28, [#allocation15], %s1787_s30, %s1787_s30, %s1788_s14  }
  0x62   :  { %s1739_s7 = scalar_lea.vmem %s143_s15, 1024  ;;  %p1744_p4 = scmp.lt.s32.totalorder %s143_s15, %s143_s15 }
  0x63   :  { %p1740_p3 = scmp.ne.s32.totalorder %s143_s15, %s1739_s7  ;;  %p1745_p5 = scmp.lt.s32.totalorder %s1739_s7, %s1739_s7 }
  0x65   :  { %p1746_p6 = por %p1745_p5, %p1744_p4 }
  0x67   :  { %p1747_p7 = pnand %p1746_p6, %p1740_p3 }
  0x69   :  { %1750 = shalt.err (!%p1747_p7)
}
  0x6a   :  { %148 = dma.hbm_to_vmem [thread:$0]  %s2009_s11, 1024, %s143_s15, [#allocation18], %s1787_s30, %s1787_s30, %s1788_s14  }
  0x6b   :  { %1771 = dma.done.wait [#allocation3], 256  }
  0x6c   :  { %1772 = vsyncadd [#allocation3], 4294967040 }
  0x6d   :  { %1773 = dma.done.wait [#allocation6], 256  }
  0x6e   :  { %1774 = vsyncadd [#allocation6], 4294967040 }
  0x6f   :  { %1775 = dma.done.wait [#allocation9], 1536  }
  0x70   :  { %1776 = vsyncadd [#allocation9], 4294965760 }
  0x71   :  { %1777 = dma.done.wait [#allocation12], 2048  }
  0x72   :  { %1778 = vsyncadd [#allocation12], 4294965248 }
  0x73   :  { %1779 = dma.done.wait [#allocation15], 2048  }
  0x74   :  { %1780 = vsyncadd [#allocation15], 4294965248 }
  0x75   :  { %1781 = dma.done.wait [#allocation18], 1024  }
  0x76   :  { %1782 = vsyncadd [#allocation18], 4294966272  ;;  %v1479_v0 = vld [vmem:[#allocation8 + $0x18] sm:$0xff]   ;;  %v1480_v1 = vld [vmem:[#allocation8 + $0x10] sm:$0xff]   ;;  %vm228_vm0 = vcmask 523264   ;;  %v1797_v6 = vmov 16  }
  0x77   :  { %1310 = vmatprep.subr.bf16.mxu0 %v1479_v0  ;;  %v1934_v2 = vld [vmem:[#allocation8 + $0x8] sm:$0xff]   ;;  %v1482_v3 = vld [vmem:[#allocation8] sm:$0xff]   ;;  %1476 = vset.pattern.permute.xlu1 %v1797_v6  ;;  %v1485_v7 = vld [vmem:[#allocation11 + $0x38] sm:$0xff]   ;;  %v1798_v45 = vmov 0.0   ;;  %vm1799_vm5 = vmmov 0   ;;  %vm576_vm6 = vcmask 261120  }
  0x78   :  { %1311 = vmatpush3.bf16.msra.mxu0 %v1479_v0  ;;  %v1483_v4 = vld [vmem:[#allocation2] sm:$0xff]   ;;  %1338 = vmatprep.mubr.bf16.mxu1 %v1482_v3  ;;  %v1484_v5 = vld [vmem:[#allocation2 + $0x8] sm:$0xff]   ;;  %v1486_v8 = vld [vmem:[#allocation11 + $0x30] sm:$0xff]   ;;  %vm871_vm9 = vcmask 130048   ;;  %s1801_s8 = smov [#allocation19]  }
  0x79   :  { %1312 = vmatprep.subr.bf16.mxu0 %v1480_v1  ;;  %1318 = vmatprep.mubr.msk.bf16.mxu0 %vm228_vm0, %v1483_v4  ;;  %v1487_v9 = vld [vmem:[#allocation10 + $0x38] sm:$0xff]   ;;  %v1489_v10 = vld [vmem:[#allocation10 + $0x30] sm:$0xff]   ;;  %v1488_v11 = vld [vmem:[#allocation11 + $0x28] sm:$0xff]   ;;  %s1163_s19 = sshll.u32 %s1801_s8, 4  ;;  %s1164_s19 = int_to_ptr.vmem [resolvable:$true] %s1163_s19 }
  0x7a   :  { %1475 = vset.pattern.permute.xlu0 %v1797_v6  ;;  %1322 = vmatprep.subr.bf16.mxu1 %v1485_v7  ;;  %v1491_v12 = vld [vmem:[#allocation10 + $0x28] sm:$0xff]   ;;  %v1490_v13 = vld [vmem:[#allocation11 + $0x20] sm:$0xff]   ;;  %v1492_v15 = vld [vmem:[#allocation11 + $0x18] sm:$0xff]   ;;  %s1751_s20 = scalar_lea.vmem %s1164_s19, 256  ;;  %p1756_p9 = scmp.lt.s32.totalorder %s1164_s19, %s1164_s19 }
  0x7b   :  { %1323 = vmatpush3.bf16.msra.mxu1 %v1485_v7  ;;  %v1493_v14 = vld [vmem:[#allocation10 + $0x20] sm:$0xff]   ;;  %v1495_v16 = vld [vmem:[#allocation10 + $0x18] sm:$0xff]   ;;  %v1494_v17 = vld [vmem:[#allocation11 + $0x10] sm:$0xff]   ;;  %p1752_p8 = scmp.ne.s32.totalorder %s1164_s19, %s1751_s20  ;;  %p1757_p10 = scmp.lt.s32.totalorder %s1751_s20, %s1751_s20 }
  0x7c   :  { %1313 = vmatpush3.bf16.msra.mxu0 %v1480_v1  ;;  %1324 = vmatprep.subr.bf16.mxu1 %v1486_v8  ;;  %v1497_v18 = vld [vmem:[#allocation10 + $0x10] sm:$0xff]   ;;  %v1496_v19 = vld [vmem:[#allocation11 + $0x8] sm:$0xff]   ;;  %v1498_v24 = vld [vmem:[#allocation11] sm:$0xff]  }
  0x7d   :  { %1314 = vmatprep.subr.bf16.mxu0 %v1934_v2  ;;  %v1499_v25 = vld [vmem:[#allocation10 + $0x8] sm:$0xff]   ;;  %v1500_v30 = vld [vmem:[#allocation10] sm:$0xff]   ;;  %v1502_v6 = vld [vmem:[#allocation14 + $0x38] sm:$0xff]   ;;  %p1758_p11 = por %p1757_p10, %p1756_p9 }
  0x7e   :  { %v1204_v51 = vld [vmem:[%s2004_s6] ss:$0 sm:$0xff]  ;;  %v1503_v7 = vld [vmem:[#allocation14 + $0x30] sm:$0xff]  }
  0x7f   :  { %1325 = vmatpush3.bf16.msra.mxu1 %v1486_v8  ;;  %v1504_v8 = vld [vmem:[#allocation14 + $0x28] sm:$0xff]   ;;  %p1759_p12 = pnand %p1758_p11, %p1752_p8 }
  0x80   :  { %1315 = vmatpush3.bf16.msra.mxu0 %v1934_v2  ;;  %1326 = vmatprep.subr.bf16.mxu1 %v1488_v11 }
  0x81   :  { %1316 = vmatprep.subr.bf16.mxu0 %v1482_v3 }
  0x83   :  { %1327 = vmatpush3.bf16.msra.mxu1 %v1488_v11  ;;  %v1507_v11 = vld [vmem:[#allocation14 + $0x10] sm:$0xff]  }
  0x84   :  { %1317 = vmatpush3.bf16.msra.mxu0 %v1482_v3  ;;  %1328 = vmatprep.subr.bf16.mxu1 %v1490_v13 }
  0x85   :  { %1342 = vmatprep.subr.bf16.mxu0 %v1487_v9 }
  0x87   :  { %1319 = vmatmul.mubr.msk.bf16.vlgmr.msra.gmra.mxu0 %vm228_vm0, %v1484_v5  ;;  %1329 = vmatpush3.bf16.msra.mxu1 %v1490_v13  ;;  %v1501_v5 = vld [vmem:[#allocation5] sm:$0xff]   ;;  %v1509_v13 = vld [vmem:[#allocation14] sm:$0xff]  }
  0x88   :  { %1343 = vmatpush3.bf16.msra.mxu0 %v1487_v9  ;;  %1330 = vmatprep.subr.bf16.mxu1 %v1492_v15  ;;  %v1505_v9 = vld [vmem:[#allocation14 + $0x20] sm:$0xff]  }
  0x89   :  { %1344 = vmatprep.subr.bf16.mxu0 %v1489_v10 }
  0x8b   :  { %1331 = vmatpush3.bf16.msra.mxu1 %v1492_v15  ;;  %v1510_v15 = vld [vmem:[#allocation13 + $0x38] sm:$0xff]  }
  0x8c   :  { %1345 = vmatpush3.bf16.msra.mxu0 %v1489_v10  ;;  %1332 = vmatprep.subr.bf16.mxu1 %v1494_v17  ;;  %v1506_v10 = vld [vmem:[#allocation14 + $0x18] sm:$0xff]  }
  0x8d   :  { %1346 = vmatprep.subr.bf16.mxu0 %v1491_v12 }
  0x8f   :  { %1333 = vmatpush3.bf16.msra.mxu1 %v1494_v17  ;;  %v1512_v17 = vld [vmem:[#allocation13 + $0x28] sm:$0xff]  }
  0x90   :  { %1347 = vmatpush3.bf16.msra.mxu0 %v1491_v12  ;;  %1334 = vmatprep.subr.bf16.mxu1 %v1496_v19  ;;  %v1508_v12 = vld [vmem:[#allocation14 + $0x8] sm:$0xff]  }
  0x91   :  { %1348 = vmatprep.subr.bf16.mxu0 %v1493_v14 }
  0x93   :  { %1335 = vmatpush3.bf16.msra.mxu1 %v1496_v19  ;;  %v1514_v19 = vld [vmem:[#allocation13 + $0x18] sm:$0xff]  }
  0x94   :  { %1349 = vmatpush3.bf16.msra.mxu0 %v1493_v14  ;;  %1336 = vmatprep.subr.bf16.mxu1 %v1498_v24  ;;  %v1800_v14 = vmov 32  }
  0x95   :  { %1350 = vmatprep.subr.bf16.mxu0 %v1495_v16 }
  0x97   :  { %1337 = vmatpush3.bf16.msra.mxu1 %v1498_v24 }
  0x98   :  { %1351 = vmatpush3.bf16.msra.mxu0 %v1495_v16  ;;  %1362 = vmatprep.subr.bf16.mxu1 %v1798_v45  ;;  %v1511_v16 = vld [vmem:[#allocation13 + $0x30] sm:$0xff]  }
  0x99   :  { %1352 = vmatprep.subr.bf16.mxu0 %v1497_v18 }
  0x9a   :  { %1339 = vmatmul.mubr.bf16.vlgmr.msra.gmra.mxu1 %v1934_v2 }
  0x9b   :  { %1366 = vmatprep.mubr.msk.bf16.mxu1 %vm1799_vm5, %v1798_v45 }
  0x9c   :  { %1353 = vmatpush3.bf16.msra.mxu0 %v1497_v18  ;;  %v1513_v18 = vld [vmem:[#allocation13 + $0x20] sm:$0xff]  }
  0x9d   :  { %1354 = vmatprep.subr.bf16.mxu0 %v1499_v25 }
  0xa0   :  { %1355 = vmatpush3.bf16.msra.mxu0 %v1499_v25  ;;  %v1516_v25 = vld [vmem:[#allocation13 + $0x8] sm:$0xff]  }
  0xa1   :  { %1356 = vmatprep.subr.bf16.mxu0 %v1500_v30 }
  0xa4   :  { %1357 = vmatpush3.bf16.msra.mxu0 %v1500_v30 }
  0xa5   :  { %1390 = vmatprep.subr.bf16.mxu0 %v1798_v45 }
 0x147   :  { %v1320_v20 = vpop.f32.mrf.mxu0 }
 0x148   :  { %1535 = vrcp.f32 %v1320_v20  ;;  %vm286_vm1 = vcmp.gt.f32.partialorder %v1320_v20, 0.0 }
 0x149   :  { %v269_v21 = vpop.f32.mrf.mxu0 }
 0x14a   :  { %1537 = vrcp.f32 %v269_v21  ;;  %vm284_vm2 = vcmp.gt.f32.partialorder %v269_v21, 0.0 }
 0x14b   :  { %v1321_v22 = vpop.f32.mrf.mxu0 }
 0x14c   :  { %1539 = vrcp.f32 %v1321_v22  ;;  %vm287_vm3 = vcmp.gt.f32.partialorder %v1321_v22, 0.0 }
 0x14d   :  { %v272_v23 = vpop.f32.mrf.mxu0 }
 0x14e   :  { %1541 = vrcp.f32 %v272_v23  ;;  %vm285_vm4 = vcmp.gt.f32.partialorder %v272_v23, 0.0 }
 0x155   :  { %v1536_v26 = vpop.eup %1535 }
 0x156   :  { %v298_v27 = vsel %vm286_vm1, %v1536_v26, 0.0 }
 0x157   :  { %v1538_v28 = vpop.eup %1537  ;;  %312 = vperm.xlu1 %1476, %v298_v27  }
 0x158   :  { %v296_v29 = vsel %vm284_vm2, %v1538_v28, 0.0  ;;  %v1517_v28 = vld [vmem:[#allocation13] sm:$0xff]  }
 0x159   :  { %v1540_v31 = vpop.eup %1539  ;;  %302 = vperm.xlu0 %1475, %v296_v29  }
 0x15a   :  { %v299_v32 = vsel %vm287_vm3, %v1540_v31, 0.0  ;;  %v1340_v46 = vpop.f32.mrf.mxu1 }
 0x15b   :  { %v1542_v33 = vpop.eup %1541  ;;  %317 = vperm.xlu1 %1476, %v299_v32  }
 0x15c   :  { %v297_v34 = vsel %vm285_vm4, %v1542_v33, 0.0  ;;  %v440_v47 = vpop.f32.mrf.mxu1 }
 0x15d   :  { %307 = vperm.xlu0 %1475, %v297_v34  }
 0x15e   :  { %v1341_v50 = vpop.f32.mrf.mxu1 }
 0x15f   :  { %1478 = vset.pattern.permute.xlu1 %v1800_v14 }
 0x160   :  { %v443_v57 = vpop.f32.mrf.mxu1 }
 0x161   :  { %1477 = vset.pattern.permute.xlu0 %v1800_v14 }
 0x1d2   :  { %v313_v35 = vpop.permute.xlu1 %312 }
 0x1d3   :  { %v322_v42 = vmul.f32 %v1320_v20, %v313_v35  ;;  %v1515_v20 = vld [vmem:[#allocation13 + $0x10] sm:$0xff]  }
 0x1d4   :  { %v303_v36 = vpop.permute.xlu0 %302 }
 0x1d5   :  { %v320_v40 = vmul.f32 %v303_v36, %v269_v21 }
 0x1d6   :  { %v318_v37 = vpop.permute.xlu1 %317 }
 0x1d7   :  { %v323_v38 = vmul.f32 %v1321_v22, %v318_v37 }
 0x1d8   :  { %v308_v39 = vpop.permute.xlu0 %307 }
 0x1d9   :  { %v321_v41 = vmul.f32 %v308_v39, %v272_v23  ;;  %v325_v44 = vpack.c.bf16 %v323_v38, %v322_v42  ;;  %v1518_v39 = vld [vmem:[#allocation17 + $0x38] sm:$0xff]   ;;  %v1520_v42 = vld [vmem:[#allocation17 + $0x28] sm:$0xff]  }
 0x1db   :  { %v324_v43 = vpack.c.bf16 %v321_v41, %v320_v40  ;;  %v1519_v41 = vld [vmem:[#allocation17 + $0x30] sm:$0xff]  }
 0x1dd   :  { %1358 = vmatprep.mubr.bf16.mxu0 %v324_v43  ;;  %v1521_v43 = vld [vmem:[#allocation17 + $0x20] sm:$0xff]  }
 0x1de   :  { %1359 = vmatmul.mubr.bf16.vlgmr.msra.gmra.mxu0 %v325_v44  ;;  %v1522_v44 = vld [vmem:[#allocation17 + $0x18] sm:$0xff]  }
 0x1df   :  { %1406 = vmatprep.mubr.msk.bf16.mxu0 %vm1799_vm5, %v1798_v45  ;;  %1391 = vmatpush3.bf16.msra.mxu0 %v1510_v15  ;;  %v1534_v15 = vld [vmem:[#allocation16] sm:$0xff]  }
 0x1e0   :  { %1392 = vmatprep.subr.bf16.mxu0 %v1798_v45 }
 0x1e3   :  { %1393 = vmatpush3.bf16.msra.mxu0 %v1511_v16 }
 0x1e4   :  { %1394 = vmatprep.subr.bf16.mxu0 %v1798_v45 }
 0x1e7   :  { %1395 = vmatpush3.bf16.msra.mxu0 %v1512_v17 }
 0x1e8   :  { %1396 = vmatprep.subr.bf16.mxu0 %v1798_v45 }
 0x1eb   :  { %1397 = vmatpush3.bf16.msra.mxu0 %v1513_v18 }
 0x1ec   :  { %1398 = vmatprep.subr.bf16.mxu0 %v1798_v45 }
 0x1ef   :  { %1399 = vmatpush3.bf16.msra.mxu0 %v1514_v19 }
 0x1f0   :  { %1400 = vmatprep.subr.bf16.mxu0 %v1798_v45 }
 0x1f3   :  { %1401 = vmatpush3.bf16.msra.mxu0 %v1515_v20 }
 0x1f4   :  { %1402 = vmatprep.subr.bf16.mxu0 %v1798_v45 }
 0x1f7   :  { %1403 = vmatpush3.bf16.msra.mxu0 %v1516_v25 }
 0x1f8   :  { %1404 = vmatprep.subr.bf16.mxu0 %v1798_v45 }
 0x1fb   :  { %1405 = vmatpush3.bf16.msra.mxu0 %v1517_v28 }
 0x1fc   :  { %1416 = vmatprep.subr.bf16.mxu0 %v1798_v45 }
 0x29e   :  { %v1360_v48 = vpop.f32.mrf.mxu0 }
 0x29f   :  { %v546_v49 = vadd.f32 %v1360_v48, %v1340_v46  ;;  %v1523_v46 = vld [vmem:[#allocation17 + $0x10] sm:$0xff]   ;;  %v1525_v48 = vld [vmem:[#allocation17] sm:$0xff]  }
 0x2a0   :  { %v537_v52 = vpop.f32.mrf.mxu0 }
 0x2a1   :  { %v561_v54 = vadd.f32 %v1204_v51, %v546_v49  ;;  %v538_v55 = vadd.f32 %v537_v52, %v440_v47  ;;  %v1524_v47 = vld [vmem:[#allocation17 + $0x8] sm:$0xff]  }
 0x2a2   :  { %v1361_v53 = vpop.f32.mrf.mxu0 }
 0x2a3   :  { %v549_v56 = vadd.f32 %v1361_v53, %v1341_v50  ;;  %v565_v61 = vmax.f32 %v561_v54, 0.0  ;;  %v559_v62 = vadd.f32 %v1204_v51, %v538_v55 }
 0x2a4   :  { %v540_v58 = vpop.f32.mrf.mxu0 }
 0x2a5   :  { %v562_v59 = vadd.f32 %v1204_v51, %v549_v56  ;;  %v541_v60 = vadd.f32 %v540_v58, %v443_v57  ;;  %v563_v3 = vmax.f32 %v559_v62, 0.0  ;;  %v1527_v62 = vld [vmem:[#allocation16 + $0x38] sm:$0xff]  }
 0x2a7   :  { %v566_v63 = vmax.f32 %v562_v59, 0.0  ;;  %v560_v0 = vadd.f32 %v1204_v51, %v541_v60  ;;  %v1223_v51 = vld [vmem:[%s2007_s9] ss:$0 sm:$0xff] }
 0x2a9   :  { %v568_v1 = vpack.c.bf16 %v566_v63, %v565_v61  ;;  %v564_v2 = vmax.f32 %v560_v0, 0.0  ;;  %v1526_v61 = vld [vmem:[#allocation7] sm:$0xff]   ;;  %v1528_v63 = vld [vmem:[#allocation16 + $0x30] sm:$0xff]   ;;  %v1529_v0 = vld [vmem:[#allocation16 + $0x28] sm:$0xff]  }
 0x2ab   :  { %1363 = vmatpush3.bf16.msra.mxu1 %v568_v1  ;;  %v567_v4 = vpack.c.bf16 %v564_v2, %v563_v3  ;;  %v1530_v1 = vld [vmem:[#allocation16 + $0x20] sm:$0xff]   ;;  %v1531_v2 = vld [vmem:[#allocation16 + $0x18] sm:$0xff]   ;;  %v1532_v3 = vld [vmem:[#allocation16 + $0x10] sm:$0xff]  }
 0x2ac   :  { %1364 = vmatprep.subr.bf16.mxu1 %v1798_v45 }
 0x2af   :  { %1365 = vmatpush3.bf16.msra.mxu1 %v567_v4 }
 0x2b0   :  { %1370 = vmatprep.subr.bf16.mxu1 %v1798_v45 }
 0x2b2   :  { %1367 = vmatmul.mubr.msk.bf16.vlgmr.msra.gmra.mxu1 %vm576_vm6, %v1501_v5 }
 0x2b3   :  { %1371 = vmatpush3.bf16.msra.mxu1 %v1502_v6  ;;  %1386 = vmatprep.mubr.msk.bf16.mxu1 %vm1799_vm5, %v1798_v45 }
 0x2b4   :  { %1372 = vmatprep.subr.bf16.mxu1 %v1798_v45 }
 0x2b7   :  { %1373 = vmatpush3.bf16.msra.mxu1 %v1503_v7 }
 0x2b8   :  { %1374 = vmatprep.subr.bf16.mxu1 %v1798_v45 }
 0x2bb   :  { %1375 = vmatpush3.bf16.msra.mxu1 %v1504_v8 }
 0x2bc   :  { %1376 = vmatprep.subr.bf16.mxu1 %v1798_v45 }
 0x2bf   :  { %1377 = vmatpush3.bf16.msra.mxu1 %v1505_v9 }
 0x2c0   :  { %1378 = vmatprep.subr.bf16.mxu1 %v1798_v45 }
 0x2c3   :  { %1379 = vmatpush3.bf16.msra.mxu1 %v1506_v10 }
 0x2c4   :  { %1380 = vmatprep.subr.bf16.mxu1 %v1798_v45 }
 0x2c7   :  { %1381 = vmatpush3.bf16.msra.mxu1 %v1507_v11 }
 0x2c8   :  { %1382 = vmatprep.subr.bf16.mxu1 %v1798_v45 }
 0x2cb   :  { %1383 = vmatpush3.bf16.msra.mxu1 %v1508_v12  ;;  %v1533_v12 = vld [vmem:[#allocation16 + $0x8] sm:$0xff]  }
 0x2cc   :  { %1384 = vmatprep.subr.bf16.mxu1 %v1798_v45 }
 0x2cf   :  { %1385 = vmatpush3.bf16.msra.mxu1 %v1509_v13 }
 0x2d0   :  { %1410 = vmatprep.subr.bf16.mxu1 %v1798_v45 }
 0x2d2   :  { %1387 = vmatmul.mubr.bf16.vlgmr.msra.gmra.mxu1 %v567_v4 }
 0x2d3   :  { %1412 = vmatprep.mubr.msk.bf16.mxu1 %vm1799_vm5, %v1798_v45 }
 0x372   :  { %v614_v21 = vpop.f32.mrf.mxu1 }
 0x373   :  { %1543 = vrcp.f32 %v614_v21  ;;  %vm621_vm7 = vcmp.gt.f32.partialorder %v614_v21, 0.0 }
 0x374   :  { %v1368_v22 = vpop.f32.mrf.mxu1 }
 0x376   :  { %v617_v23 = vpop.f32.mrf.mxu1 }
 0x377   :  { %1545 = vrcp.f32 %v617_v23  ;;  %vm622_vm8 = vcmp.gt.f32.partialorder %v617_v23, 0.0 }
 0x378   :  { %v1369_v24 = vpop.f32.mrf.mxu1 }
 0x379   :  { %v1242_v24 = vld [vmem:[%s2010_s12] ss:$0 sm:$0xff] }
 0x380   :  { %v1544_v26 = vpop.eup %1543 }
 0x381   :  { %v627_v27 = vsel %vm621_vm7, %v1544_v26, 0.0 }
 0x382   :  { %631 = vperm.xlu0 %1477, %v627_v27  }
 0x384   :  { %v1546_v29 = vpop.eup %1545 }
 0x385   :  { %v628_v30 = vsel %vm622_vm8, %v1546_v29, 0.0 }
 0x386   :  { %636 = vperm.xlu1 %1478, %v628_v30  }
 0x392   :  { %v756_v31 = vpop.f32.mrf.mxu1 }
 0x394   :  { %v1388_v32 = vpop.f32.mrf.mxu1 }
 0x396   :  { %v759_v33 = vpop.f32.mrf.mxu1 }
 0x398   :  { %v1389_v34 = vpop.f32.mrf.mxu1 }
 0x3fd   :  { %v632_v35 = vpop.permute.xlu0 %631 }
 0x3fe   :  { %v639_v37 = vmul.f32 %v632_v35, %v614_v21 }
 0x401   :  { %v637_v36 = vpop.permute.xlu1 %636 }
 0x402   :  { %v640_v38 = vmul.f32 %v637_v36, %v617_v23 }
 0x404   :  { %v641_v40 = vpack.c.bf16 %v640_v38, %v639_v37 }
 0x406   :  { %1407 = vmatmul.mubr.bf16.vlgmr.msra.gmra.mxu0 %v641_v40 }
 0x407   :  { %1417 = vmatpush3.bf16.msra.mxu0 %v1518_v39  ;;  %1432 = vmatprep.mubr.msk.bf16.mxu0 %vm1799_vm5, %v1798_v45 }
 0x408   :  { %1418 = vmatprep.subr.bf16.mxu0 %v1798_v45 }
 0x40b   :  { %1419 = vmatpush3.bf16.msra.mxu0 %v1519_v41 }
 0x40c   :  { %1420 = vmatprep.subr.bf16.mxu0 %v1798_v45 }
 0x40f   :  { %1421 = vmatpush3.bf16.msra.mxu0 %v1520_v42 }
 0x410   :  { %1422 = vmatprep.subr.bf16.mxu0 %v1798_v45 }
 0x413   :  { %1423 = vmatpush3.bf16.msra.mxu0 %v1521_v43 }
 0x414   :  { %1424 = vmatprep.subr.bf16.mxu0 %v1798_v45 }
 0x417   :  { %1425 = vmatpush3.bf16.msra.mxu0 %v1522_v44 }
 0x418   :  { %1426 = vmatprep.subr.bf16.mxu0 %v1798_v45 }
 0x41b   :  { %1427 = vmatpush3.bf16.msra.mxu0 %v1523_v46 }
 0x41c   :  { %1428 = vmatprep.subr.bf16.mxu0 %v1798_v45 }
 0x41f   :  { %1429 = vmatpush3.bf16.msra.mxu0 %v1524_v47 }
 0x420   :  { %1430 = vmatprep.subr.bf16.mxu0 %v1798_v45 }
 0x423   :  { %1431 = vmatpush3.bf16.msra.mxu0 %v1525_v48 }
 0x4c6   :  { %v845_v49 = vpop.f32.mrf.mxu0 }
 0x4c7   :  { %v846_v50 = vadd.f32 %v845_v49, %v756_v31 }
 0x4c8   :  { %v1408_v52 = vpop.f32.mrf.mxu0 }
 0x4c9   :  { %v859_v54 = vadd.f32 %v1223_v51, %v846_v50 }
 0x4ca   :  { %v848_v53 = vpop.f32.mrf.mxu0 }
 0x4cb   :  { %v849_v55 = vadd.f32 %v848_v53, %v759_v33  ;;  %v861_v58 = vmax.f32 %v859_v54, 0.0 }
 0x4cc   :  { %v1409_v56 = vpop.f32.mrf.mxu0 }
 0x4cd   :  { %v860_v57 = vadd.f32 %v1223_v51, %v849_v55 }
 0x4cf   :  { %v862_v59 = vmax.f32 %v860_v57, 0.0 }
 0x4d1   :  { %v863_v60 = vpack.c.bf16 %v862_v59, %v861_v58 }
 0x4d3   :  { %1411 = vmatpush3.bf16.msra.mxu1 %v863_v60  ;;  %1433 = vmatmul.mubr.bf16.vlgmr.msra.gmra.mxu0 %v863_v60 }
 0x4d4   :  { %1436 = vmatprep.subr.bf16.mxu1 %v1798_v45 }
 0x4d6   :  { %1413 = vmatmul.mubr.msk.bf16.vlgmr.msra.gmra.mxu1 %vm871_vm9, %v1526_v61 }
 0x4d7   :  { %1452 = vmatprep.mubr.msk.bf16.mxu1 %vm1799_vm5, %v1798_v45  ;;  %1437 = vmatpush3.bf16.msra.mxu1 %v1527_v62 }
 0x4d8   :  { %1438 = vmatprep.subr.bf16.mxu1 %v1798_v45 }
 0x4db   :  { %1439 = vmatpush3.bf16.msra.mxu1 %v1528_v63 }
 0x4dc   :  { %1440 = vmatprep.subr.bf16.mxu1 %v1798_v45 }
 0x4df   :  { %1441 = vmatpush3.bf16.msra.mxu1 %v1529_v0 }
 0x4e0   :  { %1442 = vmatprep.subr.bf16.mxu1 %v1798_v45 }
 0x4e3   :  { %1443 = vmatpush3.bf16.msra.mxu1 %v1530_v1 }
 0x4e4   :  { %1444 = vmatprep.subr.bf16.mxu1 %v1798_v45 }
 0x4e7   :  { %1445 = vmatpush3.bf16.msra.mxu1 %v1531_v2 }
 0x4e8   :  { %1446 = vmatprep.subr.bf16.mxu1 %v1798_v45 }
 0x4eb   :  { %1447 = vmatpush3.bf16.msra.mxu1 %v1532_v3 }
 0x4ec   :  { %1448 = vmatprep.subr.bf16.mxu1 %v1798_v45 }
 0x4ef   :  { %1449 = vmatpush3.bf16.msra.mxu1 %v1533_v12 }
 0x4f0   :  { %1450 = vmatprep.subr.bf16.mxu1 %v1798_v45 }
 0x4f3   :  { %1451 = vmatpush3.bf16.msra.mxu1 %v1534_v15 }
 0x593   :  { %v1051_v4 = vpop.f32.mrf.mxu0 }
 0x595   :  { %v1434_v5 = vpop.f32.mrf.mxu0 }
 0x596   :  { %v909_v6 = vpop.f32.mrf.mxu1 }
 0x597   :  { %1547 = vrcp.f32 %v909_v6  ;;  %v1054_v7 = vpop.f32.mrf.mxu0  ;;  %vm916_vm10 = vcmp.gt.f32.partialorder %v909_v6, 0.0 }
 0x598   :  { %v1414_v8 = vpop.f32.mrf.mxu1 }
 0x599   :  { %v1435_v9 = vpop.f32.mrf.mxu0 }
 0x59a   :  { %v912_v10 = vpop.f32.mrf.mxu1 }
 0x59b   :  { %1549 = vrcp.f32 %v912_v10  ;;  %vm917_vm11 = vcmp.gt.f32.partialorder %v912_v10, 0.0 }
 0x59c   :  { %v1415_v11 = vpop.f32.mrf.mxu1 }
 0x5a4   :  { %v1548_v13 = vpop.eup %1547 }
 0x5a5   :  { %v922_v14 = vsel %vm916_vm10, %v1548_v13, 0.0 }
 0x5a6   :  { %926 = vperm.xlu1 %1478, %v922_v14  }
 0x5a8   :  { %v1550_v16 = vpop.eup %1549 }
 0x5a9   :  { %v923_v17 = vsel %vm917_vm11, %v1550_v16, 0.0 }
 0x5aa   :  { %931 = vperm.xlu0 %1477, %v923_v17  }
 0x621   :  { %v927_v18 = vpop.permute.xlu1 %926 }
 0x622   :  { %v934_v20 = vmul.f32 %v927_v18, %v909_v6 }
 0x625   :  { %v932_v19 = vpop.permute.xlu0 %931 }
 0x626   :  { %v935_v21 = vmul.f32 %v932_v19, %v912_v10 }
 0x628   :  { %v936_v22 = vpack.c.bf16 %v935_v21, %v934_v20 }
 0x62a   :  { %1453 = vmatmul.mubr.bf16.vlgmr.msra.gmra.mxu1 %v936_v22 }
 0x6ea   :  { %v1140_v23 = vpop.f32.mrf.mxu1 }
 0x6eb   :  { %v1141_v45 = vadd.f32 %v1140_v23, %v1051_v4 }
 0x6ec   :  { %v1454_v25 = vpop.f32.mrf.mxu1 }
 0x6ed   :  { %v1154_v26 = vadd.f32 %v1242_v24, %v1141_v45 }
 0x6ee   :  { %v1143_v27 = vpop.f32.mrf.mxu1 }
 0x6ef   :  { %1156 = vst [vmem:[#allocation19] sm:$0xff] %v1154_v26  ;;  %v1144_v28 = vadd.f32 %v1143_v27, %v1054_v7 }
 0x6f0   :  { %v1455_v29 = vpop.f32.mrf.mxu1 }
 0x6f1   :  { %v1155_v30 = vadd.f32 %v1242_v24, %v1144_v28 }
 0x6f3   :  { %1157 = vst [vmem:[#allocation19 + $0x8] sm:$0xff] %v1155_v30 }
 0x6f4   :  { %1762 = shalt.err (!%p1759_p12)
}
 0x6f5   :  { %s1802_s12 = smov 128   ;;  %s1803_s21 = smov 8  }
 0x6f6   :  { %1169 = dma.vmem_to_hbm [thread:$0]  %s1164_s19, 256, %s2011_s13, [#allocation4], %s1802_s12, %s1802_s12, %s1803_s21  }
 0x6f7   :  { %1783 = dma.done.wait [#allocation4], 256  }
 0x6f8   :  { %1784 = vsyncadd [#allocation4], 4294967040 }
 0x6f9   :  { %1173 = vsyncpa [#allocation3], 1 }
 0x6fa   :  { %1174 = vsyncpa [#allocation6], 1 }
 0x6fb   :  { %1175 = vsyncpa [#allocation9], 1 }
 0x6fc   :  { %1176 = vsyncpa [#allocation12], 1 }
 0x6fd   :  { %1177 = vsyncpa [#allocation15], 1 }
 0x6fe   :  { %1178 = vsyncpa [#allocation18], 1 }
 0x6ff   :  { %1179 = vsyncpa [#allocation4], 1 }

</bundles_post_ra>
